<compile_context>
chip_gen: v5e
topology: v5e:2x2
jax: 0.10.0
libtpu: 0.0.40
codegen_flags: <defaults>
</compile_context>

<pallas_src>
import functools

import jax
import jax.numpy as jnp
from jax import lax
from jax.experimental import pallas as pl
from jax.experimental.pallas import tpu as pltpu


def _round_up(a, b):
    return (a + b - 1) // b * b


def _tpu_vmem_capacity_bytes():
    """Physical per-core VMEM capacity (fallback: 128 MiB for v5e/v6e)."""
    try:
        info = pltpu.get_tpu_info()
        cap = getattr(info, "vmem_capacity_bytes", None)
        if cap:
            return int(cap)
    except Exception:
        pass
    return 128 * 1024 * 1024


def _patch_merge_kernel(p0_ref, p1_ref, w0_ref, w1_ref, b_ref, o_ref, *scratch,
                        rp: int, w2p: int, aligned: bool):
    """Fused 2x2 patch merge + LayerNorm(4C) + Linear(4C -> 2C, bias folded).

    p0_ref : (tp, W2, 2C)  even-image-row halves of tp row-pairs  -> torch [x0 | x2]
    p1_ref : (tp, W2, 2C)  odd-image-row halves                   -> torch [x1 | x3]
    w0_ref : (2C, N)       folded reduction weight rows for [x0 | x2]
    w1_ref : (2C, N)       folded reduction weight rows for [x1 | x3]
    b_ref  : (1, N)  f32   folded bias (beta @ W^T)
    o_ref  : (tp, W2, N)
    scratch: only when W2 % 8 != 0: (2, rp, W2p, 2C) f32 staging buffer that
             pads W2 to the sublane quantum so the reshape feeding the MXU is
             layout-preserving.
    """
    tp, w2, c2 = p0_ref.shape
    n_out = o_ref.shape[-1]
    inv_c4 = 1.0 / (2 * c2)          # 1 / (4*C)
    mc = rp * w2p                    # merged rows per chunk (incl. pad rows)
    n_chunks = (tp + rp - 1) // rp   # static

    if not aligned:
        s_ref = scratch[0]
        # Pad rows are read by LN/matmul of every chunk and then discarded.
        # Zero them unconditionally (tiny cost) so no stale VMEM flows through
        # rsqrt / the MXU on either megacore shard.
        s_ref[:, :, w2:, :] = jnp.zeros((2, rp, w2p - w2, c2), s_ref.dtype)

    def chunk(ci, carry):
        # The last chunk may overlap the previous one (overlapping rows are
        # recomputed with identical values) so every chunk has a static size.
        off = jnp.minimum(ci * rp, tp - rp)
        a0 = p0_ref[pl.ds(off, rp), :, :].astype(jnp.float32)   # rows hold [x0 | x2]
        a1 = p1_ref[pl.ds(off, rp), :, :].astype(jnp.float32)   # rows hold [x1 | x3]

        if aligned:
            # W2 % 8 == 0 -> collapsing (rp, W2) is a layout-preserving (free) reshape.
            h0 = a0.reshape(mc, c2)
            h1 = a1.reshape(mc, c2)
        else:
            # Stage into a sublane-padded slab: aligned masked stores, no shuffles.
            s_ref[0, :, :w2, :] = a0
            s_ref[1, :, :w2, :] = a1
            h0 = s_ref[0].reshape(mc, c2)     # free: W2p % 8 == 0
            h1 = s_ref[1].reshape(mc, c2)

        # LayerNorm over the merged 4C channels (two-pass, matches torch numerics).
        total = jnp.sum(h0, axis=-1, keepdims=True) + jnp.sum(h1, axis=-1, keepdims=True)
        mean = total * inv_c4
        c0 = h0 - mean
        c1 = h1 - mean
        var = (jnp.sum(c0 * c0, axis=-1, keepdims=True)
               + jnp.sum(c1 * c1, axis=-1, keepdims=True)) * inv_c4
        inv = lax.rsqrt(var + 1e-5)
        n0 = (c0 * inv).astype(w0_ref.dtype)
        n1 = (c1 * inv).astype(w1_ref.dtype)

        # 4C -> 2C reduction on the MXU (gamma folded into W, beta into bias).
        y = jnp.dot(n0, w0_ref[...], preferred_element_type=jnp.float32)
        y = y + jnp.dot(n1, w1_ref[...], preferred_element_type=jnp.float32)
        y = y + b_ref[...]

        # Drop the sublane padding rows and store this chunk.
        y = y.reshape(rp, w2p, n_out)[:, :w2, :]
        o_ref[pl.ds(off, rp), :, :] = y.astype(o_ref.dtype)
        return carry

    lax.fori_loop(0, n_chunks, chunk, 0)


def patch_merging_pallas(x, H, W, gamma, beta, weight, *, tile_pairs=None,
                         chunk_rows=512, matmul_dtype=jnp.float32):
    """Pallas implementation of PatchMerging.forward.

    Args:
      x:      (B, H*W, C)
      gamma:  (4*C,)     LayerNorm weight
      beta:   (4*C,)     LayerNorm bias
      weight: (2*C, 4*C) torch-style nn.Linear weight (out, in), bias-free
    Returns:
      (B, ceil(H/2)*ceil(W/2), 2*C)
    """
    B, L, C = x.shape
    assert L == H * W, "input feature has wrong size"
    N = 2 * C
    C2 = 2 * C

    x = x.reshape(B, H, W, C)
    if (H % 2) or (W % 2):
        # Odd spatial size: zero-pad one row / column (same as the PyTorch module).
        x = jnp.pad(x, ((0, 0), (0, H % 2), (0, W % 2), (0, 0)))
    Hp, Wp = H + H % 2, W + W % 2
    H2, W2 = Hp // 2, Wp // 2
    n_pairs = B * H2

    # Free contiguous view: (row-pair, image-row parity, half-width, 2C);
    # the last dim is ordered (col-parity, c), i.e. [even-col C | odd-col C].
    xv = x.reshape(n_pairs, 2, W2, C2)

    # Fold LayerNorm affine into the reduction weight/bias and reorder the 4C
    # input channels to the kernel's [x0|x2 ; x1|x3] layout (LN stats are
    # permutation-invariant).
    wt = weight.astype(jnp.float32).T                      # (4C, 2C)
    wfold = gamma.astype(jnp.float32)[:, None] * wt        # gamma folded in
    w0 = jnp.concatenate([wfold[0:C], wfold[2 * C:3 * C]], axis=0).astype(matmul_dtype)
    w1 = jnp.concatenate([wfold[C:2 * C], wfold[3 * C:4 * C]], axis=0).astype(matmul_dtype)
    bias = (beta.astype(jnp.float32) @ wt).reshape(1, N)   # (1, 2C), f32

    itemsize = jnp.dtype(x.dtype).itemsize
    wsize = jnp.dtype(matmul_dtype).itemsize
    bytes_per_pair = 2 * W2 * C2 * itemsize                # both parities
    out_bytes_per_pair = W2 * N * itemsize

    sub = 8                                                # f32 sublane quantum (LN math is f32)
    W2p = _round_up(W2, sub)
    aligned = (W2 % sub == 0)

    # ---- generation-aware tiling -------------------------------------------
    vmem_cap = _tpu_vmem_capacity_bytes()
    small_vmem = vmem_cap <= 64 * 1024 * 1024              # v7x-class: 64 MiB / 2 TCs
    target_in = (6 if small_vmem else 12) * 1024 * 1024    # input bytes per grid step

    rp = max(1, min(chunk_rows // max(W2, 1), n_pairs))    # row-pairs per inner chunk
    if tile_pairs is None:
        tp = max(rp, int(target_in // max(bytes_per_pair, 1)))
        tp = min(tp, n_pairs)
        nb = pl.cdiv(n_pairs, tp)
        if small_vmem:
            # Keep the single parallel axis shardable / balanced across 2 TCs.
            if nb == 1 and n_pairs >= 2:
                nb = 2
            elif nb > 1 and nb % 2 == 1:
                nb += 1
            tp = pl.cdiv(n_pairs, nb)
    else:
        tp = min(max(1, int(tile_pairs)), n_pairs)
    rp = min(rp, tp)
    nb = pl.cdiv(n_pairs, tp)

    # ---- VMEM budget (double-buffered I/O + chunk temporaries + scratch) ----
    in_tile = tp * bytes_per_pair
    out_tile = tp * out_bytes_per_pair
    weights_bytes = 2 * C2 * N * wsize + N * 4
    scratch_bytes = 0 if aligned else 2 * rp * W2p * C2 * 4
    temps_bytes = 10 * rp * W2p * C2 * 4                   # per-chunk f32 temporaries
    need = (2 * in_tile + 2 * out_tile + 2 * weights_bytes
            + scratch_bytes + temps_bytes + (6 << 20))
    vmem_limit = int(min(max(need, 24 << 20), max(32 << 20, int(0.7 * vmem_cap))))

    m_total = n_pairs * W2
    cost = pl.CostEstimate(
        flops=int(2 * m_total * (2 * C2) * N + 10 * m_total * 2 * C2),
        transcendentals=int(m_total),
        bytes_accessed=int(n_pairs * bytes_per_pair + n_pairs * out_bytes_per_pair
                           + 2 * C2 * N * wsize),
    )

    kernel = functools.partial(_patch_merge_kernel, rp=rp, w2p=W2p, aligned=aligned)
    scratch_shapes = [] if aligned else [pltpu.VMEM((2, rp, W2p, C2), jnp.float32)]

    out = pl.pallas_call(
        kernel,
        out_shape=jax.ShapeDtypeStruct((n_pairs, W2, N), x.dtype),
        grid_spec=pltpu.PrefetchScalarGridSpec(
            num_scalar_prefetch=0,
            grid=(nb,),
            in_specs=[
                pl.BlockSpec((tp, None, W2, C2), lambda i: (i, 0, 0, 0)),  # even rows
                pl.BlockSpec((tp, None, W2, C2), lambda i: (i, 1, 0, 0)),  # odd rows
                pl.BlockSpec((C2, N), lambda i: (0, 0)),
                pl.BlockSpec((C2, N), lambda i: (0, 0)),
                pl.BlockSpec((1, N), lambda i: (0, 0)),
            ],
            out_specs=pl.BlockSpec((tp, W2, N), lambda i: (i, 0, 0)),
            scratch_shapes=scratch_shapes,
        ),
        compiler_params=pltpu.CompilerParams(
            dimension_semantics=("parallel",),
            vmem_limit_bytes=vmem_limit,
        ),
        cost_estimate=cost,
    )(xv, xv, w0, w1, bias)

    return out.reshape(B, H2 * W2, N)


def patch_merging_ref(x, H, W, gamma, beta, weight):
    """Pure-JAX (f32) reference mirroring the PyTorch module."""
    B, L, C = x.shape
    x = x.reshape(B, H, W, C).astype(jnp.float32)
    if (H % 2) or (W % 2):
        x = jnp.pad(x, ((0, 0), (0, H % 2), (0, W % 2), (0, 0)))
    x0 = x[:, 0::2, 0::2, :]
    x1 = x[:, 1::2, 0::2, :]
    x2 = x[:, 0::2, 1::2, :]
    x3 = x[:, 1::2, 1::2, :]
    x = jnp.concatenate([x0, x1, x2, x3], axis=-1)
    x = x.reshape(B, -1, 4 * C)
    mean = jnp.mean(x, axis=-1, keepdims=True)
    var = jnp.mean((x - mean) ** 2, axis=-1, keepdims=True)
    xn = (x - mean) * lax.rsqrt(var + 1e-5)
    xn = xn * gamma.astype(jnp.float32) + beta.astype(jnp.float32)
    return jnp.einsum("blk,ok->blo", xn, weight.astype(jnp.float32))


if __name__ == "__main__":
    key = jax.random.PRNGKey(0)

    def make_case(k, B, H, W, C):
        kx, kg, kb, kw = jax.random.split(k, 4)
        x = jax.random.normal(kx, (B, H * W, C), dtype=jnp.float32)
        gamma = 1.0 + 0.1 * jax.random.normal(kg, (4 * C,), dtype=jnp.float32)
        beta = 0.1 * jax.random.normal(kb, (4 * C,), dtype=jnp.float32)
        weight = jax.random.normal(kw, (2 * C, 4 * C), dtype=jnp.float32) / (4 * C) ** 0.5
        return x, gamma, beta, weight

    # (B, H, W, C, tile_pairs, chunk_rows): cover the aligned fast path
    # (no scratch), the unaligned staged path, ragged grid blocks, the
    # overlapping last inner chunk, and the odd-H/W zero-pad path.
    cases = [
        (2, 16, 16, 32, None, 512),   # aligned W2=8, auto tiling, single chunk
        (2, 12, 16, 32, 5, 16),       # aligned, ragged grid, 3 chunks (last overlaps)
        (2, 10, 10, 48, 3, 8),        # unaligned W2=5 -> staging scratch, ragged grid
        (1, 7, 9, 16, None, 512),     # odd H/W pad path, unaligned W2
    ]
    keys = jax.random.split(key, len(cases))
    for (B, H, W, C, tpairs, crows), k in zip(cases, keys):
        x, gamma, beta, weight = make_case(k, B, H, W, C)
        out = patch_merging_pallas(x, H, W, gamma, beta, weight,
                                   tile_pairs=tpairs, chunk_rows=crows)
        out = jax.block_until_ready(out)
        ref = patch_merging_ref(x, H, W, gamma, beta, weight)
        Lo = ((H + H % 2) // 2) * ((W + W % 2) // 2)
        assert out.shape == (B, Lo, 2 * C), (out.shape, (B, Lo, 2 * C))
        err = float(jnp.max(jnp.abs(out.astype(jnp.float32) - ref)))
        assert err < 2e-2, err

    print("KERNEL_OK")
</pallas_src>

<mosaic_0001>
module attributes {stable_mosaic.version = 11 : i64} {
  func.func @_patch_merge_kernel(%arg0: i32, %arg1: memref<16x1x8x64xf32, #tpu.memory_space<vmem>>, %arg2: memref<16x1x8x64xf32, #tpu.memory_space<vmem>>, %arg3: memref<64x64xf32, #tpu.memory_space<vmem>>, %arg4: memref<64x64xf32, #tpu.memory_space<vmem>>, %arg5: memref<1x64xf32, #tpu.memory_space<vmem>>, %arg6: memref<16x8x64xf32, #tpu.memory_space<vmem>>) attributes {dimension_semantics = [#tpu.dimension_semantics<parallel>], iteration_bounds = array<i64: 1>, scalar_prefetch = 0 : i64, scratch_operands = 0 : i64, tpu.core_type = #tpu.core_type<tc>, window_params = [{transform_indices = @transform_0, window_bounds = array<i64: 16, 1, 8, 64>}, {transform_indices = @transform_1, window_bounds = array<i64: 16, 1, 8, 64>}, {pipeline_mode = #tpu.pipeline_mode<synchronous>, transform_indices = @transform_2, window_bounds = array<i64: 64, 64>}, {pipeline_mode = #tpu.pipeline_mode<synchronous>, transform_indices = @transform_3, window_bounds = array<i64: 64, 64>}, {pipeline_mode = #tpu.pipeline_mode<synchronous>, transform_indices = @transform_4, window_bounds = array<i64: 1, 64>}, {transform_indices = @transform_5, window_bounds = array<i64: 16, 8, 64>}]} {
    %c0_i32 = arith.constant 0 : i32
    %c16_i32 = arith.constant 16 : i32
    %0 = arith.muli %c0_i32, %c16_i32 : i32
    %c0_i32_0 = arith.constant 0 : i32
    %1 = arith.minsi %0, %c0_i32_0 : i32
    %2 = arith.index_cast %1 : i32 to index
    %c0 = arith.constant 0 : index
    %c0_1 = arith.constant 0 : index
    %c0_2 = arith.constant 0 : index
    %3 = vector.load %arg1[%2, %c0, %c0_1, %c0_2] : memref<16x1x8x64xf32, #tpu.memory_space<vmem>>, vector<16x1x8x64xf32>
    %4 = vector.shape_cast %3 : vector<16x1x8x64xf32> to vector<16x8x64xf32>
    %5 = arith.index_cast %1 : i32 to index
    %c0_3 = arith.constant 0 : index
    %c0_4 = arith.constant 0 : index
    %c0_5 = arith.constant 0 : index
    %6 = vector.load %arg2[%5, %c0_3, %c0_4, %c0_5] : memref<16x1x8x64xf32, #tpu.memory_space<vmem>>, vector<16x1x8x64xf32>
    %7 = vector.shape_cast %6 : vector<16x1x8x64xf32> to vector<16x8x64xf32>
    %8 = vector.shape_cast %4 : vector<16x8x64xf32> to vector<128x64xf32>
    %9 = vector.shape_cast %7 : vector<16x8x64xf32> to vector<128x64xf32>
    %cst = arith.constant dense<0.000000e+00> : vector<128xf32>
    %10 = vector.multi_reduction <add>, %8, %cst [1] : vector<128x64xf32> to vector<128xf32>
    %11 = vector.shape_cast %10 : vector<128xf32> to vector<128x1xf32>
    %cst_6 = arith.constant dense<0.000000e+00> : vector<128xf32>
    %12 = vector.multi_reduction <add>, %9, %cst_6 [1] : vector<128x64xf32> to vector<128xf32>
    %13 = vector.shape_cast %12 : vector<128xf32> to vector<128x1xf32>
    %14 = arith.addf %11, %13 : vector<128x1xf32>
    %cst_7 = arith.constant 7.812500e-03 : f32
    %15 = vector.broadcast %cst_7 : f32 to vector<128x1xf32>
    %16 = arith.mulf %14, %15 : vector<128x1xf32>
    %17 = vector.broadcast %16 : vector<128x1xf32> to vector<128x64xf32>
    %18 = arith.subf %8, %17 : vector<128x64xf32>
    %19 = vector.broadcast %16 : vector<128x1xf32> to vector<128x64xf32>
    %20 = arith.subf %9, %19 : vector<128x64xf32>
    %21 = arith.mulf %18, %18 : vector<128x64xf32>
    %cst_8 = arith.constant dense<0.000000e+00> : vector<128xf32>
    %22 = vector.multi_reduction <add>, %21, %cst_8 [1] : vector<128x64xf32> to vector<128xf32>
    %23 = vector.shape_cast %22 : vector<128xf32> to vector<128x1xf32>
    %24 = arith.mulf %20, %20 : vector<128x64xf32>
    %cst_9 = arith.constant dense<0.000000e+00> : vector<128xf32>
    %25 = vector.multi_reduction <add>, %24, %cst_9 [1] : vector<128x64xf32> to vector<128xf32>
    %26 = vector.shape_cast %25 : vector<128xf32> to vector<128x1xf32>
    %27 = arith.addf %23, %26 : vector<128x1xf32>
    %cst_10 = arith.constant 7.812500e-03 : f32
    %28 = vector.broadcast %cst_10 : f32 to vector<128x1xf32>
    %29 = arith.mulf %27, %28 : vector<128x1xf32>
    %cst_11 = arith.constant 9.99999974E-6 : f32
    %30 = vector.broadcast %cst_11 : f32 to vector<128x1xf32>
    %31 = arith.addf %29, %30 : vector<128x1xf32>
    %32 = math.rsqrt %31 : vector<128x1xf32>
    %33 = vector.broadcast %32 : vector<128x1xf32> to vector<128x64xf32>
    %34 = arith.mulf %18, %33 : vector<128x64xf32>
    %35 = vector.broadcast %32 : vector<128x1xf32> to vector<128x64xf32>
    %36 = arith.mulf %20, %35 : vector<128x64xf32>
    %c0_12 = arith.constant 0 : index
    %c0_13 = arith.constant 0 : index
    %37 = vector.load %arg3[%c0_12, %c0_13] : memref<64x64xf32, #tpu.memory_space<vmem>>, vector<64x64xf32>
    %cst_14 = arith.constant dense<0.000000e+00> : vector<128x64xf32>
    %38 = tpu.matmul %34, %37, %cst_14 {dimension_numbers = #tpu.dot_dimension_numbers<[1], [0], [0], [1], [0, 0, 1, 1], [], []>} : vector<128x64xf32>, vector<64x64xf32>, vector<128x64xf32> -> vector<128x64xf32>
    %c0_15 = arith.constant 0 : index
    %c0_16 = arith.constant 0 : index
    %39 = vector.load %arg4[%c0_15, %c0_16] : memref<64x64xf32, #tpu.memory_space<vmem>>, vector<64x64xf32>
    %cst_17 = arith.constant dense<0.000000e+00> : vector<128x64xf32>
    %40 = tpu.matmul %36, %39, %cst_17 {dimension_numbers = #tpu.dot_dimension_numbers<[1], [0], [0], [1], [0, 0, 1, 1], [], []>} : vector<128x64xf32>, vector<64x64xf32>, vector<128x64xf32> -> vector<128x64xf32>
    %41 = arith.addf %38, %40 : vector<128x64xf32>
    %c0_18 = arith.constant 0 : index
    %c0_19 = arith.constant 0 : index
    %42 = vector.load %arg5[%c0_18, %c0_19] : memref<1x64xf32, #tpu.memory_space<vmem>>, vector<1x64xf32>
    %43 = vector.broadcast %42 : vector<1x64xf32> to vector<128x64xf32>
    %44 = arith.addf %41, %43 : vector<128x64xf32>
    %45 = vector.shape_cast %44 : vector<128x64xf32> to vector<16x8x64xf32>
    %46 = arith.index_cast %1 : i32 to index
    %c0_20 = arith.constant 0 : index
    %c0_21 = arith.constant 0 : index
    %47 = vector.load %arg6[%46, %c0_20, %c0_21] : memref<16x8x64xf32, #tpu.memory_space<vmem>>, vector<16x8x64xf32>
    tpu.vector_store %arg6[%46, %c0_20, %c0_21], %45 {strides = array<i32>} : memref<16x8x64xf32, #tpu.memory_space<vmem>>, vector<16x8x64xf32>,
    %c1_i32 = arith.constant 1 : i32
    return
  }
  func.func @transform_0(%arg0: i32) -> (i32, i32, i32, i32) {
    %c0_i32 = arith.constant 0 : i32
    %c0_i32_0 = arith.constant 0 : i32
    %c0_i32_1 = arith.constant 0 : i32
    %c0_i32_2 = arith.constant 0 : i32
    return %arg0, %c0_i32, %c0_i32_0, %c0_i32_1 : i32, i32, i32, i32
  }
  func.func @transform_1(%arg0: i32) -> (i32, i32, i32, i32) {
    %c1_i32 = arith.constant 1 : i32
    %c0_i32 = arith.constant 0 : i32
    %c0_i32_0 = arith.constant 0 : i32
    %c0_i32_1 = arith.constant 0 : i32
    return %arg0, %c1_i32, %c0_i32, %c0_i32_0 : i32, i32, i32, i32
  }
  func.func @transform_2(%arg0: i32) -> (i32, i32) {
    %c0_i32 = arith.constant 0 : i32
    %c0_i32_0 = arith.constant 0 : i32
    %c0_i32_1 = arith.constant 0 : i32
    return %c0_i32, %c0_i32_0 : i32, i32
  }
  func.func @transform_3(%arg0: i32) -> (i32, i32) {
    %c0_i32 = arith.constant 0 : i32
    %c0_i32_0 = arith.constant 0 : i32
    %c0_i32_1 = arith.constant 0 : i32
    return %c0_i32, %c0_i32_0 : i32, i32
  }
  func.func @transform_4(%arg0: i32) -> (i32, i32) {
    %c0_i32 = arith.constant 0 : i32
    %c0_i32_0 = arith.constant 0 : i32
    %c0_i32_1 = arith.constant 0 : i32
    return %c0_i32, %c0_i32_0 : i32, i32
  }
  func.func @transform_5(%arg0: i32) -> (i32, i32, i32) {
    %c0_i32 = arith.constant 0 : i32
    %c0_i32_0 = arith.constant 0 : i32
    %c0_i32_1 = arith.constant 0 : i32
    return %arg0, %c0_i32, %c0_i32_0 : i32, i32, i32
  }
}

</mosaic_0001>

<bundles_post_ra>
// kernel: tpu_custom_call.1
= control target key start
LH: loop header
LB: loop body
LE: loop exit
PB: predicated region body
PF: predicated region fallthrough
CT: control target
= control target key end

     0   :  { %10 = vsyncpa [#allocation3], 0  ;;  %s1699_s0 = inlined_call_operand.hbm [shape: f32[16,2,8,64], index: 0, kind: input, shape index: {}]   ;;  %s1700_s1 = inlined_call_operand.hbm [shape: f32[16,2,8,64], index: 1, kind: input, shape index: {}]   ;;  %s1701_s2 = inlined_call_operand.hbm [shape: f32[64,64], index: 2, kind: input, shape index: {}]   ;;  %s1702_s3 = inlined_call_operand.hbm [shape: f32[64,64], index: 3, kind: input, shape index: {}]   ;;  %s1703_s4 = inlined_call_operand.vmem [shape: f32[1,64], index: 4, kind: input, shape index: {}]   ;;  %s1704_s5 = inlined_call_operand.hbm [shape: f32[16,8,64], index: 5, kind: output, shape index: {}]  }
   0x1   :  { %11 = vsyncpa [#allocation6], 0 }
   0x2   :  { %12 = vsyncpa [#allocation9], 0 }
   0x3   :  { %13 = vsyncpa [#allocation4], 0  ;;  %s31_s20 = scalar_lea.hbm %s1700_s1, 8  ;;  %s1162_s22 = smov [#allocation5]  }
   0x4   :  { %s32_s21 = sshll.u32 %s31_s20, 4  ;;  %s34_s23 = sshll.u32 %s1162_s22, 4  ;;  %s33_s21 = int_to_ptr.hbm [resolvable:$true] %s32_s21  ;;  %s35_s23 = int_to_ptr.vmem [resolvable:$true] %s34_s23 }
   0x5   :  { %s18_s26 = sshll.u32 %s1699_s0, 4  ;;  %s1163_s27 = smov 256   ;;  %s19_s26 = int_to_ptr.hbm [resolvable:$true] %s18_s26 }
   0x6   :  { %s1164_s28 = smov 128   ;;  %s1165_s29 = smov 8  }
   0x7   :  { %40 = dma.hbm_to_vmem [thread:$0]  %s33_s21, 2048, %s35_s23, [#allocation6], %s1163_s27, %s1164_s28, %s1165_s29  }
   0x8   :  { %s1166_s30 = smov [#allocation2]   ;;  %s45_s8 = sshll.u32 %s1701_s2, 4  ;;  %s46_s8 = int_to_ptr.hbm [resolvable:$true] %s45_s8 }
   0x9   :  { %s20_s6 = sshll.u32 %s1166_s30, 4  ;;  %s58_s10 = sshll.u32 %s1702_s3, 4  ;;  %s21_s6 = int_to_ptr.vmem [resolvable:$true] %s20_s6  ;;  %s59_s10 = int_to_ptr.hbm [resolvable:$true] %s58_s10 }
   0xa   :  { %26 = dma.hbm_to_vmem [thread:$0]  %s19_s26, 2048, %s21_s6, [#allocation3], %s1163_s27, %s1164_s28, %s1165_s29  }
   0xb   :  { %s1167_s11 = smov [#allocation7]   ;;  %s1168_s13 = smov [#allocation8]  }
   0xc   :  { %s47_s12 = sshll.u32 %s1167_s11, 4  ;;  %s60_s14 = sshll.u32 %s1168_s13, 4  ;;  %s48_s12 = int_to_ptr.vmem [resolvable:$true] %s47_s12  ;;  %s61_s14 = int_to_ptr.vmem [resolvable:$true] %s60_s14 }
   0xd   :  { %53 = dma.hbm_to_vmem [thread:$0]  %s46_s8, 1024, %s48_s12, [#allocation6], %s1164_s28, %s1164_s28, %s1165_s29  }
   0xe   :  { %66 = dma.hbm_to_vmem [thread:$0]  %s59_s10, 1024, %s61_s14, [#allocation9], %s1164_s28, %s1164_s28, %s1165_s29  }
   0xf   :  { %1154 = dma.done.wait [#allocation3], 2048  }
  0x10   :  { %1155 = vsyncadd [#allocation3], 4294965248 }
  0x11   :  { %1156 = dma.done.wait [#allocation6], 3072  }
  0x12   :  { %1157 = vsyncadd [#allocation6], 4294964224 }
  0x13   :  { %1158 = dma.done.wait [#allocation9], 1024  }
  0x14   :  { %1159 = vsyncadd [#allocation9], 4294966272  ;;  %vm117_vm0 = vcmask 523264   ;;  %v1222_v0 = vld [vmem:[#allocation2 + $0x48] sm:$0xff]  ;;  %v1224_v1 = vld [vmem:[#allocation2 + $0x40] sm:$0xff]  ;;  %s930_s18 = sshll.u32 %s1704_s5, 4  ;;  %s931_s18 = int_to_ptr.hbm [resolvable:$true] %s930_s18 }
  0x15   :  { %v1226_v2 = vld [vmem:[#allocation2] sm:$0xff]  ;;  %v145_v3 = vsel %vm117_vm0, %v1222_v0, 0.0  ;;  %v142_v4 = vsel %vm117_vm0, %v1224_v1, 0.0  ;;  %v1234_v6 = vld [vmem:[#allocation5 + $0x48] sm:$0xff]  ;;  %v1248_v13 = vld [vmem:[#allocation2 + $0x50] sm:$0xff] }
  0x16   :  { %v118_v5 = vsel %vm117_vm0, %v1226_v2, 0.0  ;;  %146 = vadd.xlane.f32.xlu2 %v145_v3  ;;  %143 = vadd.xlane.f32.xlu0 %v142_v4  ;;  %v1236_v7 = vld [vmem:[#allocation5 + $0x40] sm:$0xff]  ;;  %v193_v9 = vsel %vm117_vm0, %v1234_v6, 0.0  ;;  %v1246_v12 = vld [vmem:[#allocation2 + $0x8] sm:$0xff]  ;;  %v148_v16 = vsel %vm117_vm0, %v1248_v13, 0.0  ;;  %v1258_v18 = vld [vmem:[#allocation5 + $0x50] sm:$0xff] }
  0x17   :  { %119 = vadd.xlane.f32.xlu1 %v118_v5  ;;  %v1238_v8 = vld [vmem:[#allocation5] sm:$0xff]  ;;  %v190_v10 = vsel %vm117_vm0, %v1236_v7, 0.0  ;;  %v1250_v14 = vld [vmem:[#allocation5 + $0x8] sm:$0xff]  ;;  %v121_v15 = vsel %vm117_vm0, %v1246_v12, 0.0  ;;  %v1260_v19 = vld [vmem:[#allocation5 + $0x10] sm:$0xff]  ;;  %v196_v21 = vsel %vm117_vm0, %v1258_v18, 0.0 }
  0x18   :  { %v166_v11 = vsel %vm117_vm0, %v1238_v8, 0.0  ;;  %v169_v17 = vsel %vm117_vm0, %v1250_v14, 0.0  ;;  %v1262_v20 = vld [vmem:[#allocation2 + $0x10] sm:$0xff]  ;;  %v172_v22 = vsel %vm117_vm0, %v1260_v19, 0.0  ;;  %v1270_v24 = vld [vmem:[#allocation2 + $0x58] sm:$0xff]  ;;  %v1284_v31 = vld [vmem:[#allocation5 + $0x60] sm:$0xff] }
  0x19   :  { %v124_v23 = vsel %vm117_vm0, %v1262_v20, 0.0  ;;  %v1272_v25 = vld [vmem:[#allocation2 + $0x18] sm:$0xff]  ;;  %v151_v27 = vsel %vm117_vm0, %v1270_v24, 0.0  ;;  %v1286_v32 = vld [vmem:[#allocation2 + $0x60] sm:$0xff]  ;;  %v202_v34 = vsel %vm117_vm0, %v1284_v31, 0.0  ;;  %v1296_v37 = vld [vmem:[#allocation2 + $0x68] sm:$0xff] }
  0x1a   :  { %v1274_v26 = vld [vmem:[#allocation5 + $0x58] sm:$0xff]  ;;  %v127_v28 = vsel %vm117_vm0, %v1272_v25, 0.0  ;;  %v154_v35 = vsel %vm117_vm0, %v1286_v32, 0.0  ;;  %v1294_v36 = vld [vmem:[#allocation2 + $0x20] sm:$0xff]  ;;  %v157_v40 = vsel %vm117_vm0, %v1296_v37, 0.0  ;;  %v1306_v42 = vld [vmem:[#allocation5 + $0x68] sm:$0xff] }
  0x1b   :  { %v199_v29 = vsel %vm117_vm0, %v1274_v26, 0.0  ;;  %v1282_v30 = vld [vmem:[#allocation5 + $0x18] sm:$0xff]  ;;  %v1298_v38 = vld [vmem:[#allocation5 + $0x20] sm:$0xff]  ;;  %v130_v39 = vsel %vm117_vm0, %v1294_v36, 0.0  ;;  %v1308_v43 = vld [vmem:[#allocation5 + $0x28] sm:$0xff]  ;;  %v205_v45 = vsel %vm117_vm0, %v1306_v42, 0.0 }
  0x1c   :  { %v175_v33 = vsel %vm117_vm0, %v1282_v30, 0.0  ;;  %v178_v41 = vsel %vm117_vm0, %v1298_v38, 0.0  ;;  %v1310_v44 = vld [vmem:[#allocation2 + $0x28] sm:$0xff]  ;;  %v181_v46 = vsel %vm117_vm0, %v1308_v43, 0.0  ;;  %v1318_v48 = vld [vmem:[#allocation2 + $0x70] sm:$0xff]  ;;  %v1330_v54 = vld [vmem:[#allocation2 + $0x78] sm:$0xff] }
  0x1d   :  { %v133_v47 = vsel %vm117_vm0, %v1310_v44, 0.0  ;;  %v1320_v49 = vld [vmem:[#allocation5 + $0x30] sm:$0xff]  ;;  %v160_v51 = vsel %vm117_vm0, %v1318_v48, 0.0  ;;  %v1332_v55 = vld [vmem:[#allocation5 + $0x78] sm:$0xff]  ;;  %v163_v57 = vsel %vm117_vm0, %v1330_v54, 0.0 }
  0x1e   :  { %194 = vadd.xlane.f32.xlu2 %v193_v9  ;;  %191 = vadd.xlane.f32.xlu0 %v190_v10  ;;  %v1322_v50 = vld [vmem:[#allocation5 + $0x70] sm:$0xff]  ;;  %v184_v52 = vsel %vm117_vm0, %v1320_v49, 0.0  ;;  %v211_v58 = vsel %vm117_vm0, %v1332_v55, 0.0  ;;  %v1342_v60 = vld [vmem:[#allocation2 + $0x38] sm:$0xff] }
  0x1f   :  { %167 = vadd.xlane.f32.xlu1 %v166_v11  ;;  %v208_v53 = vsel %vm117_vm0, %v1322_v50, 0.0  ;;  %v1334_v56 = vld [vmem:[#allocation2 + $0x30] sm:$0xff]  ;;  %v1344_v61 = vld [vmem:[#allocation5 + $0x38] sm:$0xff]  ;;  %v139_v62 = vsel %vm117_vm0, %v1342_v60, 0.0 }
  0x20   :  { %v136_v59 = vsel %vm117_vm0, %v1334_v56, 0.0  ;;  %v187_v63 = vsel %vm117_vm0, %v1344_v61, 0.0 }
  0x26   :  { %122 = vadd.xlane.f32.xlu0 %v121_v15  ;;  %149 = vadd.xlane.f32.xlu2 %v148_v16 }
  0x27   :  { %170 = vadd.xlane.f32.xlu1 %v169_v17 }
  0x2e   :  { %197 = vadd.xlane.f32.xlu0 %v196_v21  ;;  %173 = vadd.xlane.f32.xlu2 %v172_v22 }
  0x2f   :  { %125 = vadd.xlane.f32.xlu1 %v124_v23 }
  0x36   :  { %152 = vadd.xlane.f32.xlu0 %v151_v27  ;;  %128 = vadd.xlane.f32.xlu2 %v127_v28 }
  0x37   :  { %200 = vadd.xlane.f32.xlu1 %v199_v29 }
  0x3e   :  { %176 = vadd.xlane.f32.xlu0 %v175_v33  ;;  %203 = vadd.xlane.f32.xlu2 %v202_v34 }
  0x3f   :  { %155 = vadd.xlane.f32.xlu1 %v154_v35 }
  0x46   :  { %131 = vadd.xlane.f32.xlu0 %v130_v39  ;;  %158 = vadd.xlane.f32.xlu2 %v157_v40 }
  0x47   :  { %179 = vadd.xlane.f32.xlu1 %v178_v41 }
  0x4e   :  { %206 = vadd.xlane.f32.xlu0 %v205_v45  ;;  %182 = vadd.xlane.f32.xlu2 %v181_v46 }
  0x4f   :  { %134 = vadd.xlane.f32.xlu1 %v133_v47 }
  0x56   :  { %161 = vadd.xlane.f32.xlu0 %v160_v51  ;;  %185 = vadd.xlane.f32.xlu2 %v184_v52 }
  0x57   :  { %209 = vadd.xlane.f32.xlu1 %v208_v53 }
  0x5e   :  { %164 = vadd.xlane.f32.xlu2 %v163_v57  ;;  %212 = vadd.xlane.f32.xlu0 %v211_v58 }
  0x5f   :  { %137 = vadd.xlane.f32.xlu1 %v136_v59 }
  0x66   :  { %140 = vadd.xlane.f32.xlu0 %v139_v62 }
  0x67   :  { %188 = vadd.xlane.f32.xlu1 %v187_v63 }
  0x89   :  { %v147_v3 = vpop.xlane.xlu2 %146  ;;  %v144_v4 = vpop.xlane.xlu0 %143 }
  0x8a   :  { %v120_v5 = vpop.xlane.xlu1 %119 }
  0x91   :  { %v195_v9 = vpop.xlane.xlu2 %194  ;;  %v192_v10 = vpop.xlane.xlu0 %191 }
  0x92   :  { %v223_v11 = vadd.f32 %v195_v9, %v147_v3  ;;  %v222_v15 = vadd.f32 %v192_v10, %v144_v4  ;;  %v168_v16 = vpop.xlane.xlu1 %167 }
  0x93   :  { %v214_v17 = vadd.f32 %v168_v16, %v120_v5 }
  0x94   :  { %v238_v21 = vmul.f32 0.0078125, %v222_v15  ;;  %v239_v22 = vmul.f32 0.0078125, %v223_v11 }
  0x95   :  { %v230_v23 = vmul.f32 0.0078125, %v214_v17 }
  0x96   :  { %v1351_v27 = vsub.f32 %v1224_v1, %v238_v21  ;;  %v1354_v28 = vsub.f32 %v1236_v7, %v238_v21  ;;  %v1364_v35 = vsub.f32 %v1234_v6, %v239_v22  ;;  %v1374_v46 = vsub.f32 %v1222_v0, %v239_v22 }
  0x97   :  { %v1357_v29 = vsub.f32 %v1238_v8, %v230_v23  ;;  %v1369_v7 = vsub.f32 %v1226_v2, %v230_v23 }
  0x98   :  { %v286_v33 = vmul.f32 %v1351_v27, %v1351_v27  ;;  %v350_v34 = vmul.f32 %v1354_v28, %v1354_v28  ;;  %v351_v51 = vmul.f32 %v1364_v35, %v1364_v35  ;;  %v287_v53 = vmul.f32 %v1374_v46, %v1374_v46 }
  0x99   :  { %v123_v39 = vpop.xlane.xlu0 %122  ;;  %v150_v40 = vpop.xlane.xlu2 %149  ;;  %v342_v1 = vmul.f32 %v1357_v29, %v1357_v29  ;;  %v278_v2 = vmul.f32 %v1369_v7, %v1369_v7 }
  0x9a   :  { %v171_v41 = vpop.xlane.xlu1 %170  ;;  %v318_v8 = vsel %vm117_vm0, %v286_v33, 0.0  ;;  %v382_v45 = vsel %vm117_vm0, %v350_v34, 0.0  ;;  %v385_v0 = vsel %vm117_vm0, %v351_v51, 0.0  ;;  %v321_v9 = vsel %vm117_vm0, %v287_v53, 0.0 }
  0x9b   :  { %v215_v47 = vadd.f32 %v171_v41, %v123_v39  ;;  %319 = vadd.xlane.f32.xlu2 %v318_v8  ;;  %383 = vadd.xlane.f32.xlu0 %v382_v45  ;;  %v358_v6 = vsel %vm117_vm0, %v342_v1, 0.0  ;;  %v294_v4 = vsel %vm117_vm0, %v278_v2, 0.0 }
  0x9c   :  { %359 = vadd.xlane.f32.xlu1 %v358_v6 }
  0x9d   :  { %v231_v52 = vmul.f32 0.0078125, %v215_v47 }
  0x9f   :  { %v1385_v59 = vsub.f32 %v1246_v12, %v231_v52  ;;  %v1388_v62 = vsub.f32 %v1250_v14, %v231_v52 }
  0xa1   :  { %v198_v57 = vpop.xlane.xlu0 %197  ;;  %v174_v58 = vpop.xlane.xlu2 %173  ;;  %v343_v12 = vmul.f32 %v1388_v62, %v1388_v62  ;;  %v279_v14 = vmul.f32 %v1385_v59, %v1385_v59 }
  0xa2   :  { %v224_v63 = vadd.f32 %v198_v57, %v150_v40  ;;  %v126_v3 = vpop.xlane.xlu1 %125 }
  0xa3   :  { %v216_v5 = vadd.f32 %v174_v58, %v126_v3  ;;  %386 = vadd.xlane.f32.xlu2 %v385_v0  ;;  %295 = vadd.xlane.f32.xlu0 %v294_v4  ;;  %v361_v34 = vsel %vm117_vm0, %v343_v12, 0.0  ;;  %v297_v39 = vsel %vm117_vm0, %v279_v14, 0.0 }
  0xa4   :  { %v240_v10 = vmul.f32 0.0078125, %v224_v63  ;;  %322 = vadd.xlane.f32.xlu1 %v321_v9 }
  0xa5   :  { %v232_v15 = vmul.f32 0.0078125, %v216_v5 }
  0xa6   :  { %v1393_v11 = vsub.f32 %v1248_v13, %v240_v10  ;;  %v1402_v17 = vsub.f32 %v1258_v18, %v240_v10 }
  0xa7   :  { %v1405_v23 = vsub.f32 %v1262_v20, %v232_v15  ;;  %v1411_v40 = vsub.f32 %v1260_v19, %v232_v15 }
  0xa8   :  { %v288_v16 = vmul.f32 %v1393_v11, %v1393_v11  ;;  %v352_v18 = vmul.f32 %v1402_v17, %v1402_v17 }
  0xa9   :  { %v153_v21 = vpop.xlane.xlu0 %152  ;;  %v129_v22 = vpop.xlane.xlu2 %128  ;;  %v280_v20 = vmul.f32 %v1405_v23, %v1405_v23  ;;  %v344_v8 = vmul.f32 %v1411_v40, %v1411_v40 }
  0xaa   :  { %v201_v13 = vpop.xlane.xlu1 %200  ;;  %v324_v33 = vsel %vm117_vm0, %v288_v16, 0.0  ;;  %v388_v6 = vsel %vm117_vm0, %v352_v18, 0.0 }
  0xab   :  { %v225_v1 = vadd.f32 %v201_v13, %v153_v21  ;;  %362 = vadd.xlane.f32.xlu0 %v361_v34  ;;  %298 = vadd.xlane.f32.xlu2 %v297_v39  ;;  %v300_v53 = vsel %vm117_vm0, %v280_v20, 0.0  ;;  %v364_v58 = vsel %vm117_vm0, %v344_v8, 0.0 }
  0xac   :  { %325 = vadd.xlane.f32.xlu1 %v324_v33 }
  0xad   :  { %v241_v41 = vmul.f32 0.0078125, %v225_v1 }
  0xaf   :  { %v1421_v19 = vsub.f32 %v1270_v24, %v241_v41  ;;  %v1424_v51 = vsub.f32 %v1274_v26, %v241_v41 }
  0xb1   :  { %v177_v45 = vpop.xlane.xlu0 %176  ;;  %v204_v47 = vpop.xlane.xlu2 %203  ;;  %v353_v24 = vmul.f32 %v1424_v51, %v1424_v51  ;;  %v289_v26 = vmul.f32 %v1421_v19, %v1421_v19 }
  0xb2   :  { %v217_v52 = vadd.f32 %v177_v45, %v129_v22  ;;  %v156_v2 = vpop.xlane.xlu1 %155 }
  0xb3   :  { %v226_v57 = vadd.f32 %v204_v47, %v156_v2  ;;  %389 = vadd.xlane.f32.xlu2 %v388_v6  ;;  %301 = vadd.xlane.f32.xlu0 %v300_v53  ;;  %v391_v14 = vsel %vm117_vm0, %v353_v24, 0.0  ;;  %v327_v16 = vsel %vm117_vm0, %v289_v26, 0.0 }
  0xb4   :  { %v233_v0 = vmul.f32 0.0078125, %v217_v52  ;;  %365 = vadd.xlane.f32.xlu1 %v364_v58 }
  0xb5   :  { %v242_v3 = vmul.f32 0.0078125, %v226_v57 }
  0xb6   :  { %v1429_v63 = vsub.f32 %v1272_v25, %v233_v0  ;;  %v1438_v5 = vsub.f32 %v1282_v30, %v233_v0 }
  0xb7   :  { %v1441_v15 = vsub.f32 %v1286_v32, %v242_v3  ;;  %v1447_v21 = vsub.f32 %v1284_v31, %v242_v3 }
  0xb8   :  { %v281_v4 = vmul.f32 %v1429_v63, %v1429_v63  ;;  %v345_v30 = vmul.f32 %v1438_v5, %v1438_v5 }
  0xb9   :  { %v132_v9 = vpop.xlane.xlu0 %131  ;;  %v159_v10 = vpop.xlane.xlu2 %158  ;;  %v290_v32 = vmul.f32 %v1441_v15, %v1441_v15  ;;  %v354_v33 = vmul.f32 %v1447_v21, %v1447_v21 }
  0xba   :  { %v180_v25 = vpop.xlane.xlu1 %179  ;;  %v303_v12 = vsel %vm117_vm0, %v281_v4, 0.0  ;;  %v367_v1 = vsel %vm117_vm0, %v345_v30, 0.0 }
  0xbb   :  { %v218_v22 = vadd.f32 %v180_v25, %v132_v9  ;;  %392 = vadd.xlane.f32.xlu0 %v391_v14  ;;  %328 = vadd.xlane.f32.xlu2 %v327_v16  ;;  %v330_v8 = vsel %vm117_vm0, %v290_v32, 0.0  ;;  %v394_v47 = vsel %vm117_vm0, %v354_v33, 0.0 }
  0xbc   :  { %304 = vadd.xlane.f32.xlu1 %v303_v12 }
  0xbd   :  { %v234_v13 = vmul.f32 0.0078125, %v218_v22 }
  0xbf   :  { %v1457_v31 = vsub.f32 %v1294_v36, %v234_v13  ;;  %v1460_v18 = vsub.f32 %v1298_v38, %v234_v13 }
  0xc1   :  { %v207_v34 = vpop.xlane.xlu0 %206  ;;  %v183_v39 = vpop.xlane.xlu2 %182  ;;  %v346_v36 = vmul.f32 %v1460_v18, %v1460_v18  ;;  %v282_v38 = vmul.f32 %v1457_v31, %v1457_v31 }
  0xc2   :  { %v227_v41 = vadd.f32 %v207_v34, %v159_v10  ;;  %v135_v20 = vpop.xlane.xlu1 %134 }
  0xc3   :  { %v219_v45 = vadd.f32 %v183_v39, %v135_v20  ;;  %368 = vadd.xlane.f32.xlu2 %v367_v1  ;;  %331 = vadd.xlane.f32.xlu0 %v330_v8  ;;  %v370_v26 = vsel %vm117_vm0, %v346_v36, 0.0  ;;  %v306_v4 = vsel %vm117_vm0, %v282_v38, 0.0 }
  0xc4   :  { %v243_v6 = vmul.f32 0.0078125, %v227_v41  ;;  %395 = vadd.xlane.f32.xlu1 %v394_v47 }
  0xc5   :  { %v235_v2 = vmul.f32 0.0078125, %v219_v45 }
  0xc6   :  { %v1465_v52 = vsub.f32 %v1296_v37, %v243_v6  ;;  %v1474_v57 = vsub.f32 %v1306_v42, %v243_v6 }
  0xc7   :  { %v1477_v3 = vsub.f32 %v1310_v44, %v235_v2  ;;  %v1483_v9 = vsub.f32 %v1308_v43, %v235_v2 }
  0xc8   :  { %v291_v53 = vmul.f32 %v1465_v52, %v1465_v52  ;;  %v355_v42 = vmul.f32 %v1474_v57, %v1474_v57 }
  0xc9   :  { %v162_v58 = vpop.xlane.xlu0 %161  ;;  %v186_v0 = vpop.xlane.xlu2 %185  ;;  %v283_v44 = vmul.f32 %v1477_v3, %v1477_v3  ;;  %v347_v12 = vmul.f32 %v1483_v9, %v1483_v9 }
  0xca   :  { %v210_v37 = vpop.xlane.xlu1 %209  ;;  %v333_v24 = vsel %vm117_vm0, %v291_v53, 0.0  ;;  %v397_v14 = vsel %vm117_vm0, %v355_v42, 0.0 }
  0xcb   :  { %v228_v10 = vadd.f32 %v210_v37, %v162_v58  ;;  %371 = vadd.xlane.f32.xlu0 %v370_v26  ;;  %307 = vadd.xlane.f32.xlu2 %v306_v4  ;;  %v309_v32 = vsel %vm117_vm0, %v283_v44, 0.0  ;;  %v373_v39 = vsel %vm117_vm0, %v347_v12, 0.0  ;;  %v661_v44 = vld [vmem:[#allocation8 + $0x38] sm:$0xff] }
  0xcc   :  { %334 = vadd.xlane.f32.xlu1 %v333_v24  ;;  %v653_v12 = vld [vmem:[#allocation7 + $0x38] sm:$0xff]  ;;  %977 = vmatpush.msra.mxu2 %v661_v44 }
  0xcd   :  { %v244_v25 = vmul.f32 0.0078125, %v228_v10  ;;  %985 = vmatpush.msra.mxu3 %v653_v12  ;;  %718 = vmatpush.msra.mxu0 %v661_v44 }
  0xce   :  { %831 = vmatpush.msra.mxu1 %v653_v12 }
  0xcf   :  { %v1493_v43 = vsub.f32 %v1318_v48, %v244_v25  ;;  %v1496_v30 = vsub.f32 %v1322_v50, %v244_v25 }
  0xd1   :  { %v165_v16 = vpop.xlane.xlu2 %164  ;;  %v213_v22 = vpop.xlane.xlu0 %212  ;;  %v356_v20 = vmul.f32 %v1496_v30, %v1496_v30  ;;  %v292_v48 = vmul.f32 %v1493_v43, %v1493_v43 }
  0xd2   :  { %v138_v13 = vpop.xlane.xlu1 %137  ;;  %v229_v33 = vadd.f32 %v213_v22, %v165_v16  ;;  %v652_v16 = vld [vmem:[#allocation7 + $0x30] sm:$0xff]  ;;  %v659_v22 = vld [vmem:[#allocation8 + $0x28] sm:$0xff] }
  0xd3   :  { %v220_v34 = vadd.f32 %v186_v0, %v138_v13  ;;  %398 = vadd.xlane.f32.xlu2 %v397_v14  ;;  %310 = vadd.xlane.f32.xlu0 %v309_v32  ;;  %v400_v36 = vsel %vm117_vm0, %v356_v20, 0.0  ;;  %v336_v38 = vsel %vm117_vm0, %v292_v48, 0.0  ;;  %v660_v14 = vld [vmem:[#allocation8 + $0x30] sm:$0xff]  ;;  %v651_v13 = vld [vmem:[#allocation7 + $0x28] sm:$0xff]  ;;  %v658_v32 = vld [vmem:[#allocation8 + $0x20] sm:$0xff] }
  0xd4   :  { %374 = vadd.xlane.f32.xlu1 %v373_v39  ;;  %v245_v1 = vmul.f32 0.0078125, %v229_v33  ;;  %978 = vmatpush.msra.mxu2 %v660_v14  ;;  %v650_v33 = vld [vmem:[#allocation7 + $0x20] sm:$0xff]  ;;  %v649_v39 = vld [vmem:[#allocation7 + $0x18] sm:$0xff]  ;;  %v655_v20 = vld [vmem:[#allocation8 + $0x8] sm:$0xff] }
  0xd5   :  { %v236_v41 = vmul.f32 0.0078125, %v220_v34  ;;  %986 = vmatpush.msra.mxu3 %v652_v16  ;;  %719 = vmatpush.msra.mxu0 %v660_v14  ;;  %v657_v34 = vld [vmem:[#allocation8 + $0x18] sm:$0xff]  ;;  %v647_v48 = vld [vmem:[#allocation7 + $0x8] sm:$0xff] }
  0xd6   :  { %v1508_v8 = vsub.f32 %v1330_v54, %v245_v1  ;;  %v1511_v45 = vsub.f32 %v1332_v55, %v245_v1  ;;  %832 = vmatpush.msra.mxu1 %v652_v16  ;;  %979 = vmatpush.msra.mxu2 %v659_v22  ;;  %v656_v1 = vld [vmem:[#allocation8 + $0x10] sm:$0xff] }
  0xd7   :  { %v1505_v50 = vsub.f32 %v1334_v56, %v236_v41  ;;  %v1516_v2 = vsub.f32 %v1320_v49, %v236_v41  ;;  %987 = vmatpush.msra.mxu3 %v651_v13  ;;  %720 = vmatpush.msra.mxu0 %v659_v22  ;;  %v648_v41 = vld [vmem:[#allocation7 + $0x10] sm:$0xff] }
  0xd8   :  { %v293_v55 = vmul.f32 %v1508_v8, %v1508_v8  ;;  %v357_v0 = vmul.f32 %v1511_v45, %v1511_v45  ;;  %833 = vmatpush.msra.mxu1 %v651_v13  ;;  %980 = vmatpush.msra.mxu2 %v658_v32 }
  0xd9   :  { %v284_v47 = vmul.f32 %v1505_v50, %v1505_v50  ;;  %v141_v6 = vpop.xlane.xlu0 %140  ;;  %v348_v49 = vmul.f32 %v1516_v2, %v1516_v2  ;;  %988 = vmatpush.msra.mxu3 %v650_v33  ;;  %721 = vmatpush.msra.mxu0 %v658_v32 }
  0xda   :  { %v189_v53 = vpop.xlane.xlu1 %188  ;;  %v339_v26 = vsel %vm117_vm0, %v293_v55, 0.0  ;;  %v403_v4 = vsel %vm117_vm0, %v357_v0, 0.0  ;;  %834 = vmatpush.msra.mxu1 %v650_v33  ;;  %981 = vmatpush.msra.mxu2 %v657_v34 }
  0xdb   :  { %401 = vadd.xlane.f32.xlu0 %v400_v36  ;;  %337 = vadd.xlane.f32.xlu2 %v336_v38  ;;  %v312_v54 = vsel %vm117_vm0, %v284_v47, 0.0  ;;  %v221_v56 = vadd.f32 %v189_v53, %v141_v6  ;;  %v376_v10 = vsel %vm117_vm0, %v348_v49, 0.0  ;;  %v654_v47 = vld [vmem:[#allocation8] sm:$0xff] }
  0xdc   :  { %313 = vadd.xlane.f32.xlu1 %v312_v54  ;;  %989 = vmatpush.msra.mxu3 %v649_v39  ;;  %v646_v6 = vld [vmem:[#allocation7] sm:$0xff] }
  0xdd   :  { %v237_v58 = vmul.f32 0.0078125, %v221_v56  ;;  %722 = vmatpush.msra.mxu0 %v657_v34  ;;  %835 = vmatpush.msra.mxu1 %v649_v39 }
  0xde   :  { %982 = vmatpush.msra.mxu2 %v656_v1  ;;  %990 = vmatpush.msra.mxu3 %v648_v41 }
  0xdf   :  { %v1528_v37 = vsub.f32 %v1342_v60, %v237_v58  ;;  %v1531_v24 = vsub.f32 %v1344_v61, %v237_v58  ;;  %723 = vmatpush.msra.mxu0 %v656_v1  ;;  %836 = vmatpush.msra.mxu1 %v648_v41 }
  0xe0   :  { %983 = vmatpush.msra.mxu2 %v655_v20  ;;  %991 = vmatpush.msra.mxu3 %v647_v48 }
  0xe1   :  { %v349_v42 = vmul.f32 %v1531_v24, %v1531_v24  ;;  %v285_v25 = vmul.f32 %v1528_v37, %v1528_v37  ;;  %724 = vmatpush.msra.mxu0 %v655_v20  ;;  %837 = vmatpush.msra.mxu1 %v647_v48 }
  0xe2   :  { %984 = vmatpush.msra.mxu2 %v654_v47  ;;  %992 = vmatpush.msra.mxu3 %v646_v6 }
  0xe3   :  { %340 = vadd.xlane.f32.xlu0 %v339_v26  ;;  %377 = vadd.xlane.f32.xlu2 %v376_v10  ;;  %v379_v60 = vsel %vm117_vm0, %v349_v42, 0.0  ;;  %v315_v61 = vsel %vm117_vm0, %v285_v25, 0.0 }
  0xe4   :  { %404 = vadd.xlane.f32.xlu1 %v403_v4  ;;  %725 = vmatpush.msra.mxu0 %v654_v47 }
  0xe5   :  { %838 = vmatpush.msra.mxu1 %v646_v6 }
  0xeb   :  { %380 = vadd.xlane.f32.xlu0 %v379_v60  ;;  %316 = vadd.xlane.f32.xlu2 %v315_v61 }
 0x10e   :  { %v320_v36 = vpop.xlane.xlu2 %319  ;;  %v384_v38 = vpop.xlane.xlu0 %383 }
 0x10f   :  { %v414_v53 = vadd.f32 %v384_v38, %v320_v36  ;;  %v360_v54 = vpop.xlane.xlu1 %359 }
 0x111   :  { %v430_v56 = vmul.f32 0.0078125, %v414_v53 }
 0x113   :  { %v446_v55 = vadd.f32 1e-05, %v430_v56 }
 0x115   :  { %1002 = vrsqrt.f32 %v446_v55  ;;  %vm540_vm2 = vweird.f32 %v446_v55 }
 0x116   :  { %v387_v58 = vpop.xlane.xlu2 %386  ;;  %v296_v0 = vpop.xlane.xlu0 %295 }
 0x117   :  { %v406_v49 = vadd.f32 %v360_v54, %v296_v0  ;;  %v323_v26 = vpop.xlane.xlu1 %322 }
 0x118   :  { %v415_v4 = vadd.f32 %v387_v58, %v323_v26 }
 0x119   :  { %v422_v10 = vmul.f32 0.0078125, %v406_v49 }
 0x11a   :  { %v431_v42 = vmul.f32 0.0078125, %v415_v4 }
 0x11b   :  { %v1003_v25 = vpop.eup %1002  ;;  %v438_v60 = vadd.f32 1e-05, %v422_v10 }
 0x11c   :  { %v535_v61 = vmul.f32 %v1003_v25, %v446_v55  ;;  %v447_v44 = vadd.f32 1e-05, %v431_v42  ;;  %vm541_vm1 = vweird.f32 %v1003_v25 }
 0x11d   :  { %1004 = vrsqrt.f32 %v438_v60  ;;  %vm542_vm3 = vmor %vm540_vm2, %vm541_vm1  ;;  %vm460_vm6 = vweird.f32 %v438_v60 }
 0x11e   :  { %v536_v12 = vmul.f32 %v1003_v25, %v535_v61  ;;  %1006 = vrsqrt.f32 %v447_v44  ;;  %v363_v14 = vpop.xlane.xlu0 %362  ;;  %v299_v16 = vpop.xlane.xlu2 %298  ;;  %vm550_vm8 = vweird.f32 %v447_v44 }
 0x11f   :  { %v407_v22 = vadd.f32 %v363_v14, %v299_v16  ;;  %v326_v13 = vpop.xlane.xlu1 %325 }
 0x120   :  { %v537_v32 = vmul.f32 0.5, %v536_v12 }
 0x121   :  { %v423_v33 = vmul.f32 0.0078125, %v407_v22 }
 0x122   :  { %v538_v34 = vsub.f32 1.5, %v537_v32 }
 0x123   :  { %v1005_v39 = vpop.eup %1004  ;;  %v1542_v1 = vadd.f32 1e-05, %v423_v33 }
 0x124   :  { %v1007_v41 = vpop.eup %1006  ;;  %v455_v20 = vmul.f32 %v1005_v39, %v438_v60  ;;  %v539_v48 = vmul.f32 %v1003_v25, %v538_v34  ;;  %vm461_vm4 = vweird.f32 %v1005_v39 }
 0x125   :  { %v545_v47 = vmul.f32 %v1007_v41, %v447_v44  ;;  %1008 = vrsqrt.f32 %v1542_v1  ;;  %vm551_vm5 = vweird.f32 %v1007_v41  ;;  %vm462_vm7 = vmor %vm460_vm6, %vm461_vm4  ;;  %vm470_vm11 = vweird.f32 %v1542_v1 }
 0x126   :  { %v456_v6 = vmul.f32 %v1005_v39, %v455_v20  ;;  %v390_v36 = vpop.xlane.xlu2 %389  ;;  %v302_v38 = vpop.xlane.xlu0 %301  ;;  %v543_v53 = vsel %vm542_vm3, %v1003_v25, %v539_v48  ;;  %vm552_vm9 = vmor %vm550_vm8, %vm551_vm5 }
 0x127   :  { %v546_v54 = vmul.f32 %v1007_v41, %v545_v47  ;;  %v416_v56 = vadd.f32 %v390_v36, %v326_v13  ;;  %v366_v58 = vpop.xlane.xlu1 %365  ;;  %v638_v0 = vmul.f32 %v543_v53, %v1354_v28  ;;  %v622_v49 = vmul.f32 %v543_v53, %v1351_v27 }
 0x128   :  { %v457_v26 = vmul.f32 0.5, %v456_v6  ;;  %v408_v4 = vadd.f32 %v366_v58, %v302_v38 }
 0x129   :  { %v547_v55 = vmul.f32 0.5, %v546_v54  ;;  %v432_v10 = vmul.f32 0.0078125, %v416_v56  ;;  %953 = vmatmul.msk.f32.vlgmr.msra.gmra.mxu2 %vm117_vm0, %v638_v0  ;;  %969 = vmatmul.msk.f32.vlgmr.msra.gmra.mxu3 %vm117_vm0, %v622_v49 }
 0x12a   :  { %v458_v42 = vsub.f32 1.5, %v457_v26  ;;  %v424_v61 = vmul.f32 0.0078125, %v408_v4 }
 0x12b   :  { %v1009_v12 = vpop.eup %1008  ;;  %v548_v25 = vsub.f32 1.5, %v547_v55  ;;  %v1549_v14 = vadd.f32 1e-05, %v432_v10 }
 0x12c   :  { %v465_v28 = vmul.f32 %v1009_v12, %v1542_v1  ;;  %v1552_v27 = vadd.f32 1e-05, %v424_v61  ;;  %v459_v16 = vmul.f32 %v1005_v39, %v458_v42  ;;  %vm471_vm10 = vweird.f32 %v1009_v12 }
 0x12d   :  { %1010 = vrsqrt.f32 %v1549_v14  ;;  %v549_v22 = vmul.f32 %v1007_v41, %v548_v25  ;;  %vm472_vm12 = vmor %vm470_vm11, %vm471_vm10  ;;  %vm560_vm15 = vweird.f32 %v1549_v14 }
 0x12e   :  { %v466_v13 = vmul.f32 %v1009_v12, %v465_v28  ;;  %1012 = vrsqrt.f32 %v1552_v27  ;;  %v393_v32 = vpop.xlane.xlu0 %392  ;;  %v329_v33 = vpop.xlane.xlu2 %328  ;;  %v463_v34 = vsel %vm462_vm7, %v1005_v39, %v459_v16  ;;  %vm480_vm2 = vweird.f32 %v1552_v27 }
 0x12f   :  { %v417_v20 = vadd.f32 %v393_v32, %v329_v33  ;;  %v305_v48 = vpop.xlane.xlu1 %304  ;;  %v630_v60 = vmul.f32 %v463_v34, %v1357_v29  ;;  %v553_v47 = vsel %vm552_vm9, %v1007_v41, %v549_v22  ;;  %v614_v6 = vmul.f32 %v463_v34, %v1369_v7 }
 0x130   :  { %v467_v36 = vmul.f32 0.5, %v466_v13  ;;  %v639_v44 = vmul.f32 %v553_v47, %v1364_v35  ;;  %v623_v38 = vmul.f32 %v553_v47, %v1374_v46 }
 0x131   :  { %v433_v53 = vmul.f32 0.0078125, %v417_v20  ;;  %945 = vmatmul.msk.f32.vlgmr.msra.gmra.mxu0 %vm117_vm0, %v630_v60  ;;  %961 = vmatmul.msk.f32.vlgmr.msra.gmra.mxu1 %vm117_vm0, %v614_v6 }
 0x132   :  { %v468_v54 = vsub.f32 1.5, %v467_v36  ;;  %954 = vmatmul.msk.f32.gmra.mxu2 %vm117_vm0, %v639_v44  ;;  %970 = vmatmul.msk.f32.gmra.mxu3 %vm117_vm0, %v623_v38 }
 0x133   :  { %v1011_v29 = vpop.eup %1010  ;;  %v1564_v39 = vadd.f32 1e-05, %v433_v53 }
 0x134   :  { %v1013_v7 = vpop.eup %1012  ;;  %v555_v35 = vmul.f32 %v1011_v29, %v1549_v14  ;;  %v469_v46 = vmul.f32 %v1009_v12, %v468_v54  ;;  %vm561_vm13 = vweird.f32 %v1011_v29 }
 0x135   :  { %v475_v41 = vmul.f32 %v1013_v7, %v1552_v27  ;;  %1014 = vrsqrt.f32 %v1564_v39  ;;  %vm481_vm14 = vweird.f32 %v1013_v7  ;;  %vm562_vm1 = vmor %vm560_vm15, %vm561_vm13  ;;  %vm570_vm5 = vweird.f32 %v1564_v39 }
 0x136   :  { %v556_v56 = vmul.f32 %v1011_v29, %v555_v35  ;;  %v369_v58 = vpop.xlane.xlu2 %368  ;;  %v332_v0 = vpop.xlane.xlu0 %331  ;;  %v473_v49 = vsel %vm472_vm12, %v1009_v12, %v469_v46  ;;  %vm482_vm3 = vmor %vm480_vm2, %vm481_vm14 }
 0x137   :  { %v476_v26 = vmul.f32 %v1013_v7, %v475_v41  ;;  %v409_v4 = vadd.f32 %v369_v58, %v305_v48  ;;  %v396_v55 = vpop.xlane.xlu1 %395  ;;  %v631_v10 = vmul.f32 %v473_v49, %v1388_v62  ;;  %v615_v42 = vmul.f32 %v473_v49, %v1385_v59 }
 0x138   :  { %v557_v1 = vmul.f32 0.5, %v556_v56  ;;  %v418_v61 = vadd.f32 %v396_v55, %v332_v0 }
 0x139   :  { %v477_v25 = vmul.f32 0.5, %v476_v26  ;;  %v425_v28 = vmul.f32 0.0078125, %v409_v4  ;;  %946 = vmatmul.msk.f32.gmra.mxu0 %vm117_vm0, %v631_v10  ;;  %962 = vmatmul.msk.f32.gmra.mxu1 %vm117_vm0, %v615_v42 }
 0x13a   :  { %v558_v16 = vsub.f32 1.5, %v557_v1  ;;  %v434_v22 = vmul.f32 0.0078125, %v418_v61 }
 0x13b   :  { %v1015_v13 = vpop.eup %1014  ;;  %v478_v12 = vsub.f32 1.5, %v477_v25  ;;  %v1574_v32 = vadd.f32 1e-05, %v425_v28 }
 0x13c   :  { %v565_v59 = vmul.f32 %v1015_v13, %v1564_v39  ;;  %v1578_v62 = vadd.f32 1e-05, %v434_v22  ;;  %v559_v33 = vmul.f32 %v1011_v29, %v558_v16  ;;  %vm571_vm4 = vweird.f32 %v1015_v13 }
 0x13d   :  { %1016 = vrsqrt.f32 %v1574_v32  ;;  %v479_v34 = vmul.f32 %v1013_v7, %v478_v12  ;;  %vm572_vm6 = vmor %vm570_vm5, %vm571_vm4  ;;  %vm490_vm9 = vweird.f32 %v1574_v32 }
 0x13e   :  { %v566_v20 = vmul.f32 %v1015_v13, %v565_v59  ;;  %1018 = vrsqrt.f32 %v1578_v62  ;;  %v372_v48 = vpop.xlane.xlu0 %371  ;;  %v308_v60 = vpop.xlane.xlu2 %307  ;;  %v563_v47 = vsel %vm562_vm1, %v1011_v29, %v559_v33  ;;  %vm580_vm11 = vweird.f32 %v1578_v62 }
 0x13f   :  { %v410_v6 = vadd.f32 %v372_v48, %v308_v60  ;;  %v335_v14 = vpop.xlane.xlu1 %334  ;;  %v483_v36 = vsel %vm482_vm3, %v1013_v7, %v479_v34  ;;  %v640_v44 = vmul.f32 %v563_v47, %v1402_v17  ;;  %v624_v38 = vmul.f32 %v563_v47, %v1393_v11 }
 0x140   :  { %v567_v53 = vmul.f32 0.5, %v566_v20  ;;  %v632_v27 = vmul.f32 %v483_v36, %v1411_v40  ;;  %v616_v54 = vmul.f32 %v483_v36, %v1405_v23 }
 0x141   :  { %v426_v35 = vmul.f32 0.0078125, %v410_v6  ;;  %955 = vmatmul.msk.f32.gmra.mxu2 %vm117_vm0, %v640_v44  ;;  %971 = vmatmul.msk.f32.gmra.mxu3 %vm117_vm0, %v624_v38 }
 0x142   :  { %v568_v46 = vsub.f32 1.5, %v567_v53  ;;  %947 = vmatmul.msk.f32.gmra.mxu0 %vm117_vm0, %v632_v27  ;;  %963 = vmatmul.msk.f32.gmra.mxu1 %vm117_vm0, %v616_v54 }
 0x143   :  { %v1017_v29 = vpop.eup %1016  ;;  %v1591_v17 = vadd.f32 1e-05, %v426_v35 }
 0x144   :  { %v1019_v11 = vpop.eup %1018  ;;  %v485_v40 = vmul.f32 %v1017_v29, %v1574_v32  ;;  %v569_v23 = vmul.f32 %v1015_v13, %v568_v46  ;;  %vm491_vm7 = vweird.f32 %v1017_v29 }
 0x145   :  { %v575_v7 = vmul.f32 %v1019_v11, %v1578_v62  ;;  %1020 = vrsqrt.f32 %v1591_v17  ;;  %vm581_vm8 = vweird.f32 %v1019_v11  ;;  %vm492_vm10 = vmor %vm490_vm9, %vm491_vm7  ;;  %vm500_vm14 = vweird.f32 %v1591_v17 }
 0x146   :  { %v486_v41 = vmul.f32 %v1017_v29, %v485_v40  ;;  %v399_v56 = vpop.xlane.xlu2 %398  ;;  %v311_v58 = vpop.xlane.xlu0 %310  ;;  %v573_v0 = vsel %vm572_vm6, %v1015_v13, %v569_v23  ;;  %vm582_vm12 = vmor %vm580_vm11, %vm581_vm8 }
 0x147   :  { %v576_v49 = vmul.f32 %v1019_v11, %v575_v7  ;;  %v419_v26 = vadd.f32 %v399_v56, %v335_v14  ;;  %v375_v4 = vpop.xlane.xlu1 %374  ;;  %v641_v55 = vmul.f32 %v573_v0, %v1424_v51  ;;  %v625_v10 = vmul.f32 %v573_v0, %v1421_v19 }
 0x148   :  { %v487_v39 = vmul.f32 0.5, %v486_v41  ;;  %v411_v42 = vadd.f32 %v375_v4, %v311_v58 }
 0x149   :  { %v577_v1 = vmul.f32 0.5, %v576_v49  ;;  %v435_v61 = vmul.f32 0.0078125, %v419_v26  ;;  %956 = vmatmul.msk.f32.gmra.mxu2 %vm117_vm0, %v641_v55  ;;  %972 = vmatmul.msk.f32.gmra.mxu3 %vm117_vm0, %v625_v10 }
 0x14a   :  { %v488_v25 = vsub.f32 1.5, %v487_v39  ;;  %v427_v28 = vmul.f32 0.0078125, %v411_v42 }
 0x14b   :  { %v1021_v16 = vpop.eup %1020  ;;  %v578_v22 = vsub.f32 1.5, %v577_v1  ;;  %v1601_v13 = vadd.f32 1e-05, %v435_v61 }
 0x14c   :  { %v495_v19 = vmul.f32 %v1021_v16, %v1591_v17  ;;  %v1605_v51 = vadd.f32 1e-05, %v427_v28  ;;  %v489_v12 = vmul.f32 %v1017_v29, %v488_v25  ;;  %vm501_vm13 = vweird.f32 %v1021_v16 }
 0x14d   :  { %1022 = vrsqrt.f32 %v1601_v13  ;;  %v579_v59 = vmul.f32 %v1019_v11, %v578_v22  ;;  %vm502_vm15 = vmor %vm500_vm14, %vm501_vm13  ;;  %vm590_vm3 = vweird.f32 %v1601_v13 }
 0x14e   :  { %v496_v33 = vmul.f32 %v1021_v16, %v495_v19  ;;  %1024 = vrsqrt.f32 %v1605_v51  ;;  %v402_v34 = vpop.xlane.xlu0 %401  ;;  %v338_v20 = vpop.xlane.xlu2 %337  ;;  %v493_v48 = vsel %vm492_vm10, %v1017_v29, %v489_v12  ;;  %vm510_vm5 = vweird.f32 %v1605_v51 }
 0x14f   :  { %v420_v60 = vadd.f32 %v402_v34, %v338_v20  ;;  %v314_v32 = vpop.xlane.xlu1 %313  ;;  %v633_v47 = vmul.f32 %v493_v48, %v1438_v5  ;;  %v583_v6 = vsel %vm582_vm12, %v1019_v11, %v579_v59  ;;  %v617_v14 = vmul.f32 %v493_v48, %v1429_v63 }
 0x150   :  { %v497_v36 = vmul.f32 0.5, %v496_v33  ;;  %v642_v62 = vmul.f32 %v583_v6, %v1447_v21  ;;  %v626_v44 = vmul.f32 %v583_v6, %v1441_v15 }
 0x151   :  { %v436_v38 = vmul.f32 0.0078125, %v420_v60  ;;  %948 = vmatmul.msk.f32.gmra.mxu0 %vm117_vm0, %v633_v47  ;;  %964 = vmatmul.msk.f32.gmra.mxu1 %vm117_vm0, %v617_v14 }
 0x152   :  { %v498_v53 = vsub.f32 1.5, %v497_v36  ;;  %957 = vmatmul.msk.f32.gmra.mxu2 %vm117_vm0, %v642_v62  ;;  %973 = vmatmul.msk.f32.gmra.mxu3 %vm117_vm0, %v626_v44 }
 0x153   :  { %v1023_v5 = vpop.eup %1022  ;;  %v1618_v27 = vadd.f32 1e-05, %v436_v38 }
 0x154   :  { %v1025_v63 = vpop.eup %1024  ;;  %v585_v21 = vmul.f32 %v1023_v5, %v1601_v13  ;;  %v499_v15 = vmul.f32 %v1021_v16, %v498_v53  ;;  %vm591_vm1 = vweird.f32 %v1023_v5 }
 0x155   :  { %v505_v54 = vmul.f32 %v1025_v63, %v1605_v51  ;;  %1026 = vrsqrt.f32 %v1618_v27  ;;  %vm511_vm2 = vweird.f32 %v1025_v63  ;;  %vm592_vm4 = vmor %vm590_vm3, %vm591_vm1  ;;  %vm600_vm8 = vweird.f32 %v1618_v27 }
 0x156   :  { %v586_v35 = vmul.f32 %v1023_v5, %v585_v21  ;;  %v341_v46 = vpop.xlane.xlu0 %340  ;;  %v378_v29 = vpop.xlane.xlu2 %377  ;;  %v503_v11 = vsel %vm502_vm15, %v1021_v16, %v499_v15  ;;  %vm512_vm6 = vmor %vm510_vm5, %vm511_vm2 }
 0x157   :  { %v506_v40 = vmul.f32 %v1025_v63, %v505_v54  ;;  %v412_v23 = vadd.f32 %v378_v29, %v314_v32  ;;  %v405_v7 = vpop.xlane.xlu1 %404  ;;  %v634_v41 = vmul.f32 %v503_v11, %v1460_v18  ;;  %v618_v56 = vmul.f32 %v503_v11, %v1457_v31 }
 0x158   :  { %v587_v17 = vmul.f32 0.5, %v586_v35  ;;  %v421_v58 = vadd.f32 %v405_v7, %v341_v46 }
 0x159   :  { %v507_v0 = vmul.f32 0.5, %v506_v40  ;;  %v428_v49 = vmul.f32 0.0078125, %v412_v23  ;;  %949 = vmatmul.msk.f32.gmra.mxu0 %vm117_vm0, %v634_v41  ;;  %965 = vmatmul.msk.f32.gmra.mxu1 %vm117_vm0, %v618_v56 }
 0x15a   :  { %v588_v26 = vsub.f32 1.5, %v587_v17  ;;  %v437_v4 = vmul.f32 0.0078125, %v421_v58 }
 0x15b   :  { %v1027_v55 = vpop.eup %1026  ;;  %v508_v10 = vsub.f32 1.5, %v507_v0  ;;  %v444_v39 = vadd.f32 1e-05, %v428_v49 }
 0x15c   :  { %v595_v18 = vmul.f32 %v1027_v55, %v1618_v27  ;;  %v453_v31 = vadd.f32 1e-05, %v437_v4  ;;  %v589_v42 = vmul.f32 %v1023_v5, %v588_v26  ;;  %vm601_vm7 = vweird.f32 %v1027_v55 }
 0x15d   :  { %1028 = vrsqrt.f32 %v444_v39  ;;  %v509_v1 = vmul.f32 %v1025_v63, %v508_v10  ;;  %vm602_vm9 = vmor %vm600_vm8, %vm601_vm7  ;;  %vm520_vm12 = vweird.f32 %v444_v39 }
 0x15e   :  { %v596_v61 = vmul.f32 %v1027_v55, %v595_v18  ;;  %1030 = vrsqrt.f32 %v453_v31  ;;  %v381_v25 = vpop.xlane.xlu0 %380  ;;  %v317_v28 = vpop.xlane.xlu2 %316  ;;  %v593_v16 = vsel %vm592_vm4, %v1023_v5, %v589_v42  ;;  %vm610_vm14 = vweird.f32 %v453_v31 }
 0x15f   :  { %v413_v22 = vadd.f32 %v381_v25, %v317_v28  ;;  %v513_v19 = vsel %vm512_vm6, %v1025_v63, %v509_v1  ;;  %v643_v12 = vmul.f32 %v593_v16, %v1474_v57  ;;  %v627_v13 = vmul.f32 %v593_v16, %v1465_v52 }
 0x160   :  { %v597_v59 = vmul.f32 0.5, %v596_v61  ;;  %v635_v33 = vmul.f32 %v513_v19, %v1483_v9  ;;  %v619_v34 = vmul.f32 %v513_v19, %v1477_v3 }
 0x161   :  { %v429_v51 = vmul.f32 0.0078125, %v413_v22  ;;  %958 = vmatmul.msk.f32.gmra.mxu2 %vm117_vm0, %v643_v12  ;;  %974 = vmatmul.msk.f32.gmra.mxu3 %vm117_vm0, %v627_v13 }
 0x162   :  { %v598_v20 = vsub.f32 1.5, %v597_v59  ;;  %950 = vmatmul.msk.f32.gmra.mxu0 %vm117_vm0, %v635_v33  ;;  %966 = vmatmul.msk.f32.gmra.mxu1 %vm117_vm0, %v619_v34 }
 0x163   :  { %v1029_v48 = vpop.eup %1028  ;;  %v445_v57 = vadd.f32 1e-05, %v429_v51 }
 0x164   :  { %v1031_v60 = vpop.eup %1030  ;;  %v515_v52 = vmul.f32 %v1029_v48, %v444_v39  ;;  %v599_v9 = vmul.f32 %v1027_v55, %v598_v20  ;;  %vm521_vm10 = vweird.f32 %v1029_v48 }
 0x165   :  { %v605_v3 = vmul.f32 %v1031_v60, %v453_v31  ;;  %1032 = vrsqrt.f32 %v445_v57  ;;  %vm611_vm11 = vweird.f32 %v1031_v60  ;;  %vm522_vm13 = vmor %vm520_vm12, %vm521_vm10  ;;  %vm530_vm2 = vweird.f32 %v445_v57 }
 0x166   :  { %v516_v32 = vmul.f32 %v1029_v48, %v515_v52  ;;  %v603_v47 = vsel %vm602_vm9, %v1027_v55, %v599_v9  ;;  %vm612_vm15 = vmor %vm610_vm14, %vm611_vm11 }
 0x167   :  { %v606_v6 = vmul.f32 %v1031_v60, %v605_v3  ;;  %v644_v14 = vmul.f32 %v603_v47, %v1496_v30  ;;  %v628_v36 = vmul.f32 %v603_v47, %v1493_v43 }
 0x168   :  { %v517_v62 = vmul.f32 0.5, %v516_v32 }
 0x169   :  { %v607_v44 = vmul.f32 0.5, %v606_v6  ;;  %959 = vmatmul.msk.f32.gmra.mxu2 %vm117_vm0, %v644_v14  ;;  %975 = vmatmul.msk.f32.gmra.mxu3 %vm117_vm0, %v628_v36 }
 0x16a   :  { %v518_v38 = vsub.f32 1.5, %v517_v62 }
 0x16b   :  { %v1033_v53 = vpop.eup %1032  ;;  %v608_v5 = vsub.f32 1.5, %v607_v44 }
 0x16c   :  { %v525_v27 = vmul.f32 %v1033_v53, %v445_v57  ;;  %v519_v63 = vmul.f32 %v1029_v48, %v518_v38  ;;  %vm531_vm1 = vweird.f32 %v1033_v53 }
 0x16d   :  { %v609_v21 = vmul.f32 %v1031_v60, %v608_v5  ;;  %vm532_vm3 = vmor %vm530_vm2, %vm531_vm1 }
 0x16e   :  { %v526_v30 = vmul.f32 %v1033_v53, %v525_v27  ;;  %v523_v43 = vsel %vm522_vm13, %v1029_v48, %v519_v63 }
 0x16f   :  { %v636_v15 = vmul.f32 %v523_v43, %v1516_v2  ;;  %v613_v54 = vsel %vm612_vm15, %v1031_v60, %v609_v21  ;;  %v620_v35 = vmul.f32 %v523_v43, %v1505_v50 }
 0x170   :  { %v527_v46 = vmul.f32 0.5, %v526_v30  ;;  %v645_v29 = vmul.f32 %v613_v54, %v1511_v45  ;;  %v629_v11 = vmul.f32 %v613_v54, %v1508_v8  ;;  %v1659_v8 = vld [vmem:[%s1703_s4] ss:$0 sm:$0xff]  ;;  %s1169_s4 = smov [#allocation10]  }
 0x171   :  { %951 = vmatmul.msk.f32.gmra.mxu0 %vm117_vm0, %v636_v15  ;;  %967 = vmatmul.msk.f32.gmra.mxu1 %vm117_vm0, %v620_v35  ;;  %s928_s15 = sshll.u32 %s1169_s4, 4  ;;  %s929_s15 = int_to_ptr.vmem [resolvable:$true] %s928_s15 }
 0x172   :  { %v528_v40 = vsub.f32 1.5, %v527_v46  ;;  %960 = vmatmul.msk.f32.gmra.mxu2 %vm117_vm0, %v645_v29  ;;  %976 = vmatmul.msk.f32.gmra.mxu3 %vm117_vm0, %v629_v11 }
 0x174   :  { %v529_v2 = vmul.f32 %v1033_v53, %v528_v40 }
 0x176   :  { %v533_v23 = vsel %vm532_vm3, %v1033_v53, %v529_v2 }
 0x177   :  { %v637_v50 = vmul.f32 %v533_v23, %v1531_v24  ;;  %v621_v45 = vmul.f32 %v533_v23, %v1528_v37 }
 0x179   :  { %952 = vmatmul.msk.f32.gmra.mxu0 %vm117_vm0, %v637_v50  ;;  %968 = vmatmul.msk.f32.gmra.mxu1 %vm117_vm0, %v621_v45 }
 0x1ac   :  { %v751_v7 = vpop.f32.mrf.mxu2  ;;  %v864_v41 = vpop.f32.mrf.mxu3 }
 0x1ad   :  { %v865_v56 = vadd.f32 %v864_v41, %v751_v7 }
 0x1ae   :  { %v727_v17 = vpop.f32.mrf.mxu0  ;;  %v840_v58 = vpop.f32.mrf.mxu1 }
 0x1af   :  { %v900_v0 = vadd.f32 %v1659_v8, %v865_v56  ;;  %v841_v49 = vadd.f32 %v840_v58, %v727_v17 }
 0x1b1   :  { %916 = vst.msk [vmem:[#allocation10 + $0x40] sm:$0xff] %vm117_vm0, %v900_v0  ;;  %v892_v37 = vadd.f32 %v1659_v8, %v841_v49 }
 0x1b3   :  { %908 = vst.msk [vmem:[#allocation10] sm:$0xff] %vm117_vm0, %v892_v37 }
 0x1b5   :  { %v754_v24 = vpop.f32.mrf.mxu2  ;;  %v867_v26 = vpop.f32.mrf.mxu3 }
 0x1b6   :  { %v868_v4 = vadd.f32 %v867_v26, %v754_v24  ;;  %v730_v55 = vpop.f32.mrf.mxu0  ;;  %v843_v10 = vpop.f32.mrf.mxu1 }
 0x1b7   :  { %v844_v39 = vadd.f32 %v843_v10, %v730_v55 }
 0x1b8   :  { %v901_v18 = vadd.f32 %v1659_v8, %v868_v4 }
 0x1b9   :  { %v893_v31 = vadd.f32 %v1659_v8, %v844_v39 }
 0x1ba   :  { %917 = vst.msk [vmem:[#allocation10 + $0x48] sm:$0xff] %vm117_vm0, %v901_v18 }
 0x1bb   :  { %909 = vst.msk [vmem:[#allocation10 + $0x8] sm:$0xff] %vm117_vm0, %v893_v31 }
 0x1bf   :  { %v733_v42 = vpop.f32.mrf.mxu0  ;;  %v846_v1 = vpop.f32.mrf.mxu1 }
 0x1c0   :  { %v847_v61 = vadd.f32 %v846_v1, %v733_v42 }
 0x1c2   :  { %v894_v25 = vadd.f32 %v1659_v8, %v847_v61 }
 0x1c4   :  { %910 = vst.msk [vmem:[#allocation10 + $0x10] sm:$0xff] %vm117_vm0, %v894_v25  ;;  %v757_v28 = vpop.f32.mrf.mxu2  ;;  %v870_v16 = vpop.f32.mrf.mxu3 }
 0x1c5   :  { %v871_v22 = vadd.f32 %v870_v16, %v757_v28 }
 0x1c7   :  { %v902_v19 = vadd.f32 %v1659_v8, %v871_v22 }
 0x1c9   :  { %918 = vst.msk [vmem:[#allocation10 + $0x50] sm:$0xff] %vm117_vm0, %v902_v19 }
 0x1cc   :  { %v760_v12 = vpop.f32.mrf.mxu2  ;;  %v873_v13 = vpop.f32.mrf.mxu3 }
 0x1cd   :  { %v874_v59 = vadd.f32 %v873_v13, %v760_v12 }
 0x1ce   :  { %v736_v33 = vpop.f32.mrf.mxu0  ;;  %v849_v34 = vpop.f32.mrf.mxu1 }
 0x1cf   :  { %v903_v51 = vadd.f32 %v1659_v8, %v874_v59  ;;  %v850_v20 = vadd.f32 %v849_v34, %v736_v33 }
 0x1d1   :  { %919 = vst.msk [vmem:[#allocation10 + $0x58] sm:$0xff] %vm117_vm0, %v903_v51  ;;  %v895_v48 = vadd.f32 %v1659_v8, %v850_v20 }
 0x1d3   :  { %911 = vst.msk [vmem:[#allocation10 + $0x18] sm:$0xff] %vm117_vm0, %v895_v48 }
 0x1d5   :  { %v763_v57 = vpop.f32.mrf.mxu2  ;;  %v876_v60 = vpop.f32.mrf.mxu3 }
 0x1d6   :  { %v877_v52 = vadd.f32 %v876_v60, %v763_v57  ;;  %v739_v9 = vpop.f32.mrf.mxu0  ;;  %v852_v3 = vpop.f32.mrf.mxu1 }
 0x1d7   :  { %v853_v32 = vadd.f32 %v852_v3, %v739_v9 }
 0x1d8   :  { %v904_v47 = vadd.f32 %v1659_v8, %v877_v52 }
 0x1d9   :  { %v896_v6 = vadd.f32 %v1659_v8, %v853_v32 }
 0x1da   :  { %920 = vst.msk [vmem:[#allocation10 + $0x60] sm:$0xff] %vm117_vm0, %v904_v47 }
 0x1db   :  { %912 = vst.msk [vmem:[#allocation10 + $0x20] sm:$0xff] %vm117_vm0, %v896_v6 }
 0x1df   :  { %v742_v14 = vpop.f32.mrf.mxu0  ;;  %v855_v36 = vpop.f32.mrf.mxu1 }
 0x1e0   :  { %v856_v62 = vadd.f32 %v855_v36, %v742_v14 }
 0x1e2   :  { %v897_v44 = vadd.f32 %v1659_v8, %v856_v62 }
 0x1e4   :  { %913 = vst.msk [vmem:[#allocation10 + $0x28] sm:$0xff] %vm117_vm0, %v897_v44  ;;  %v766_v38 = vpop.f32.mrf.mxu2  ;;  %v879_v53 = vpop.f32.mrf.mxu3 }
 0x1e5   :  { %v880_v5 = vadd.f32 %v879_v53, %v766_v38 }
 0x1e7   :  { %v905_v27 = vadd.f32 %v1659_v8, %v880_v5 }
 0x1e9   :  { %921 = vst.msk [vmem:[#allocation10 + $0x68] sm:$0xff] %vm117_vm0, %v905_v27 }
 0x1ec   :  { %v769_v63 = vpop.f32.mrf.mxu2  ;;  %v882_v21 = vpop.f32.mrf.mxu3 }
 0x1ed   :  { %v883_v30 = vadd.f32 %v882_v21, %v769_v63 }
 0x1ee   :  { %v745_v43 = vpop.f32.mrf.mxu0  ;;  %v858_v15 = vpop.f32.mrf.mxu1 }
 0x1ef   :  { %v906_v54 = vadd.f32 %v1659_v8, %v883_v30  ;;  %v859_v35 = vadd.f32 %v858_v15, %v745_v43 }
 0x1f1   :  { %922 = vst.msk [vmem:[#allocation10 + $0x70] sm:$0xff] %vm117_vm0, %v906_v54  ;;  %v898_v46 = vadd.f32 %v1659_v8, %v859_v35 }
 0x1f3   :  { %914 = vst.msk [vmem:[#allocation10 + $0x30] sm:$0xff] %vm117_vm0, %v898_v46 }
 0x1f5   :  { %v772_v29 = vpop.f32.mrf.mxu2  ;;  %v885_v11 = vpop.f32.mrf.mxu3 }
 0x1f6   :  { %v886_v40 = vadd.f32 %v885_v11, %v772_v29  ;;  %v748_v2 = vpop.f32.mrf.mxu0  ;;  %v861_v23 = vpop.f32.mrf.mxu1 }
 0x1f7   :  { %v862_v50 = vadd.f32 %v861_v23, %v748_v2 }
 0x1f8   :  { %v907_v45 = vadd.f32 %v1659_v8, %v886_v40 }
 0x1f9   :  { %v899_v7 = vadd.f32 %v1659_v8, %v862_v50 }
 0x1fa   :  { %923 = vst.msk [vmem:[#allocation10 + $0x78] sm:$0xff] %vm117_vm0, %v907_v45 }
 0x1fb   :  { %915 = vst.msk [vmem:[#allocation10 + $0x38] sm:$0xff] %vm117_vm0, %v899_v7 }
 0x1fc   :  { %936 = dma.vmem_to_hbm [thread:$0]  %s929_s15, 2048, %s931_s18, [#allocation4], %s1164_s28, %s1164_s28, %s1165_s29  }
 0x1fd   :  { %1160 = dma.done.wait [#allocation4], 2048  }
 0x1fe   :  { %1161 = vsyncadd [#allocation4], 4294965248 }
 0x1ff   :  { %941 = vsyncpa [#allocation3], 1 }
 0x200   :  { %942 = vsyncpa [#allocation6], 1 }
 0x201   :  { %943 = vsyncpa [#allocation9], 1 }
 0x202   :  { %944 = vsyncpa [#allocation4], 1 }

</bundles_post_ra>
